<compile_context>
chip_gen: v6e
topology: v6e:2x2x1
jax: 0.10.0
libtpu: 0.0.40
codegen_flags: <defaults>
</compile_context>

<pallas_src>
import functools

import jax
import jax.numpy as jnp
from jax import lax
from jax.experimental import pallas as pl
from jax.experimental.pallas import tpu as pltpu

FORCE_MAG = 3.0
DT = 0.05
INPUT_NOISE_STD = 0.01
OUTPUT_NOISE_STD = 0.001

_TWO_PI = 6.283185307179586


def _round_up(x, m):
    return (x + m - 1) // m * m


# ---------------------------------------------------------------------------
# In-kernel counter-based RNG (pure jnp -> lowers on Mosaic and interpreter).
# ---------------------------------------------------------------------------
def _hash32(x):
    """lowbias32 integer mixer on uint32."""
    x = x ^ (x >> 16)
    x = x * jnp.uint32(0x7FEB352D)
    x = x ^ (x >> 15)
    x = x * jnp.uint32(0x846CA68B)
    x = x ^ (x >> 16)
    return x


def _uniform_12(bits):
    """uint32 bits -> float32 uniform in [1, 2) (exponent trick, no convert)."""
    mant = (bits >> 9) | jnp.uint32(0x3F800000)
    return lax.bitcast_convert_type(mant, jnp.float32)


def _normal_pair(ctr_a, ctr_b):
    """Two independent standard normals per element via paired Box-Muller."""
    f1 = _uniform_12(_hash32(ctr_a))          # [1, 2)
    f2 = _uniform_12(_hash32(ctr_b))          # [1, 2)
    u1 = 2.0 - f1                             # (0, 1]  (safe for log)
    u2 = f2 - 1.0                             # [0, 1)
    r = jnp.sqrt(-2.0 * jnp.log(u1))
    ang = _TWO_PI * u2
    return r * jnp.cos(ang), r * jnp.sin(ang)


# ---------------------------------------------------------------------------
# Kernel
# ---------------------------------------------------------------------------
def _cartpole_kernel(params_ref, seed_ref, state_ref, u_ref, out_ref, *,
                     add_noise):
    # Precomputed scalar physics params from SMEM.
    gravity       = params_ref[0]
    inv_tm        = params_ref[1]     # 1 / (masscart + masspole)
    pml           = params_ref[2]     # masspole * length
    pml_inv_tm    = params_ref[3]     # pml / total_mass
    four_thirds_l = params_ref[4]     # 4/3 * length
    len_mp_inv_tm = params_ref[5]     # length * masspole / total_mass
    in_std        = params_ref[6]
    out_std       = params_ref[7]

    # Dense (rt, 128) component tiles (batch on sublanes x lanes).
    x   = state_ref[0]
    dx  = state_ref[1]
    th  = state_ref[2]
    dth = state_ref[3]
    u   = u_ref[...]

    if add_noise:
        rt, nl = u.shape
        rows = lax.broadcasted_iota(jnp.int32, (rt, nl), 0)
        lane = lax.broadcasted_iota(jnp.int32, (rt, nl), 1)
        gidx = (pl.program_id(0) * rt + rows) * nl + lane        # global elem id
        base = (gidx.astype(jnp.uint32) * jnp.uint32(6)
                + seed_ref[0].astype(jnp.uint32) * jnp.uint32(0x9E3779B9))
        # 3 (u1,u2) pairs -> 6 normals per element; 5 are consumed.
        z0, z1 = _normal_pair(base, base + jnp.uint32(1))
        z2, z3 = _normal_pair(base + jnp.uint32(2), base + jnp.uint32(3))
        z4, _  = _normal_pair(base + jnp.uint32(4), base + jnp.uint32(5))
        u = u + in_std * z4                       # input noise (before clamp)

    u = jnp.clip(u, -FORCE_MAG, FORCE_MAG)

    cos_th = jnp.cos(th)
    sin_th = jnp.sin(th)

    cart_in = (u + pml * dth * dth * sin_th) * inv_tm
    denom = four_thirds_l - len_mp_inv_tm * cos_th * cos_th
    th_acc = (gravity * sin_th - cos_th * cart_in) / denom
    xacc = cart_in - pml_inv_tm * th_acc * cos_th

    if add_noise:
        out_ref[0] = x + DT * dx + out_std * z0
        out_ref[1] = dx + DT * xacc + out_std * z1
        out_ref[2] = th + DT * dth + out_std * z2
        out_ref[3] = dth + DT * th_acc + out_std * z3
    else:
        out_ref[0] = x + DT * dx
        out_ref[1] = dx + DT * xacc
        out_ref[2] = th + DT * dth
        out_ref[3] = dth + DT * th_acc


# ---------------------------------------------------------------------------
# pallas_call driver on the SoA (4, R, 128)/(R, 128) layout.
# ---------------------------------------------------------------------------
def _cartpole_pallas(packed, seed, state_t, u_t, *, add_noise, rows_per_block):
    _, R, L = state_t.shape
    grid = R // rows_per_block
    n_elem = R * L
    cost = pl.CostEstimate(
        flops=40 * n_elem,
        transcendentals=(14 if add_noise else 2) * n_elem,
        bytes_accessed=(4 + 1 + 4) * 4 * n_elem,
    )
    return pl.pallas_call(
        functools.partial(_cartpole_kernel, add_noise=add_noise),
        out_shape=jax.ShapeDtypeStruct((4, R, L), jnp.float32),
        grid=(grid,),
        in_specs=[
            pl.BlockSpec(memory_space=pltpu.MemorySpace.SMEM),     # packed params
            pl.BlockSpec(memory_space=pltpu.MemorySpace.SMEM),     # seed
            pl.BlockSpec((4, rows_per_block, L), lambda i: (0, i, 0)),
            pl.BlockSpec((rows_per_block, L), lambda i: (i, 0)),
        ],
        out_specs=pl.BlockSpec((4, rows_per_block, L), lambda i: (0, i, 0)),
        compiler_params=pltpu.CompilerParams(
            dimension_semantics=("parallel",)),
        cost_estimate=cost,
    )(packed, seed, state_t, u_t)


def _pack_params(params, input_noise_std, output_noise_std):
    gravity, masscart, masspole, length = (params[0], params[1],
                                           params[2], params[3])
    total_mass = masscart + masspole
    inv_tm = 1.0 / total_mass
    pml = masspole * length
    return jnp.stack([
        gravity,
        inv_tm,
        pml,
        pml * inv_tm,
        (4.0 / 3.0) * length,
        length * masspole * inv_tm,
        jnp.float32(input_noise_std),
        jnp.float32(output_noise_std),
    ]).astype(jnp.float32)


def cartpole_dx_forward_soa(params, state_soa, u_soa, key, *,
                            input_noise_std=INPUT_NOISE_STD,
                            output_noise_std=OUTPUT_NOISE_STD,
                            rows_per_block=8):
    """SoA entry point: state_soa (4, R, 128), u_soa (R, 128) -> (4, R, 128).

    Callers that keep this layout avoid the AoS<->SoA HBM pass entirely.
    """
    packed = _pack_params(jnp.asarray(params, jnp.float32),
                          input_noise_std, output_noise_std)
    seed = jax.random.randint(key, (1,), 0, jnp.iinfo(jnp.int32).max,
                              dtype=jnp.int32)
    add_noise = (float(input_noise_std) != 0.0) or (float(output_noise_std) != 0.0)
    return _cartpole_pallas(packed, seed, state_soa, u_soa,
                            add_noise=add_noise, rows_per_block=rows_per_block)


@functools.partial(jax.jit, static_argnames=("input_noise_std",
                                             "output_noise_std",
                                             "max_rows_per_block"))
def cartpole_dx_forward(params, state, u, key, *,
                        input_noise_std=INPUT_NOISE_STD,
                        output_noise_std=OUTPUT_NOISE_STD,
                        max_rows_per_block=1024):
    """Pallas equivalent of CartpoleDx.forward.

    params: (4,) f32 [gravity, masscart, masspole, length]
    state : (B, 4) or (4,) f32
    u     : (B, 1) or (1,) f32
    key   : PRNG key; seeds the in-kernel counter RNG (the torch.randn noise,
            statistically equivalent rather than bitwise identical)
    """
    if state.ndim == 1:                       # torch keeps the batch dim it adds
        state = state[None, :]
        u = u[None, :]
    state = jnp.asarray(state, jnp.float32)
    u = jnp.asarray(u, jnp.float32)
    params = jnp.asarray(params, jnp.float32)
    B = state.shape[0]

    packed = _pack_params(params, input_noise_std, output_noise_std)
    seed = jax.random.randint(key, (1,), 0, jnp.iinfo(jnp.int32).max,
                              dtype=jnp.int32)
    add_noise = (float(input_noise_std) != 0.0) or (float(output_noise_std) != 0.0)

    # Sublane-dense SoA layout: batch -> (rows, 128 lanes), rt a multiple of 8.
    R0 = -(-B // 128)                                     # row-groups needed
    rt = max(8, min(max_rows_per_block, _round_up(-(-R0 // 2), 8)))
    R = _round_up(R0, rt)
    Bp = R * 128

    # TODO(synk): this pad/transpose is one extra XLA pass over the tensors;
    # use cartpole_dx_forward_soa when the caller can hold the SoA layout.
    state_p = jnp.zeros((Bp, 4), jnp.float32).at[:B, :].set(state)
    u_p = jnp.zeros((Bp,), jnp.float32).at[:B].set(u[:, 0])
    state_t = state_p.T.reshape(4, R, 128)
    u_t = u_p.reshape(R, 128)

    out_t = _cartpole_pallas(packed, seed, state_t, u_t,
                             add_noise=add_noise, rows_per_block=rt)

    return out_t.reshape(4, Bp).T[:B]


# ---------------------------------------------------------------------------
# Pure-JAX reference (noiseless) and self-test
# ---------------------------------------------------------------------------
def _reference_forward_noiseless(params, state, u):
    gravity, masscart, masspole, length = [params[i] for i in range(4)]
    total_mass = masspole + masscart
    polemass_length = masspole * length
    uc = jnp.clip(u[:, 0], -FORCE_MAG, FORCE_MAG)
    x, dx, th, dth = [state[:, i] for i in range(4)]
    cos_th, sin_th = jnp.cos(th), jnp.sin(th)
    cart_in = (uc + polemass_length * dth ** 2 * sin_th) / total_mass
    th_acc = (gravity * sin_th - cos_th * cart_in) / (
        length * (4.0 / 3.0 - masspole * cos_th ** 2 / total_mass))
    xacc = cart_in - polemass_length * th_acc * cos_th / total_mass
    x = x + DT * dx
    dx = dx + DT * xacc
    th = th + DT * dth
    dth = dth + DT * th_acc
    return jnp.stack((x, dx, th, dth), 1)


if __name__ == "__main__":
    # Deterministic parameters from CartpoleDx.__init__ (no checkpoint).
    params = jnp.array([9.8, 1.0, 0.1, 0.5], dtype=jnp.float32)

    key = jax.random.PRNGKey(0)
    k_state, k_u, k_noise = jax.random.split(key, 3)
    B = 8
    state = jax.random.normal(k_state, (B, 4), dtype=jnp.float32)
    u = jax.random.normal(k_u, (B, 1), dtype=jnp.float32)

    # 1) Exact dynamics check: noise stds forced to 0 -> must match the
    #    pure-JAX noiseless reference.
    out_clean = cartpole_dx_forward(params, state, u, k_noise,
                                    input_noise_std=0.0,
                                    output_noise_std=0.0)
    out_clean = jax.block_until_ready(out_clean)
    ref_clean = _reference_forward_noiseless(params, state, u)
    assert out_clean.shape == (B, 4)
    assert jnp.allclose(out_clean, ref_clean, atol=1e-5, rtol=1e-5), \
        "dynamics mismatch vs reference"

    # 2) Full forward with in-kernel noise (module semantics; counter-RNG noise
    #    is statistically equivalent to torch.randn, not bitwise identical).
    out = cartpole_dx_forward(params, state, u, k_noise)
    out = jax.block_until_ready(out)
    assert out.shape == (B, 4)
    assert bool(jnp.all(jnp.isfinite(out)))
    assert float(jnp.max(jnp.abs(out - ref_clean))) < 0.05, \
        "noisy output too far from noiseless dynamics"

    print("KERNEL_OK")
</pallas_src>

<mosaic_0001>
module attributes {stable_mosaic.version = 11 : i64} {
  func.func @_cartpole_kernel(%arg0: i32, %arg1: memref<8xf32, #tpu.memory_space<smem>>, %arg2: memref<1xi32, #tpu.memory_space<smem>>, %arg3: memref<4x8x128xf32, #tpu.memory_space<vmem>>, %arg4: memref<8x128xf32, #tpu.memory_space<vmem>>, %arg5: memref<4x8x128xf32, #tpu.memory_space<vmem>>) attributes {dimension_semantics = [#tpu.dimension_semantics<parallel>], iteration_bounds = array<i64: 1>, scalar_prefetch = 0 : i64, scratch_operands = 0 : i64, tpu.core_type = #tpu.core_type<tc>, window_params = [{transform_indices = @transform_0, window_bounds = array<i64: 8>}, {transform_indices = @transform_1, window_bounds = array<i64: 1>}, {transform_indices = @transform_2, window_bounds = array<i64: 4, 8, 128>}, {transform_indices = @transform_3, window_bounds = array<i64: 8, 128>}, {transform_indices = @transform_4, window_bounds = array<i64: 4, 8, 128>}]} {
    %c0 = arith.constant 0 : index
    %0 = memref.load %arg1[%c0] : memref<8xf32, #tpu.memory_space<smem>>
    %c1 = arith.constant 1 : index
    %1 = memref.load %arg1[%c1] : memref<8xf32, #tpu.memory_space<smem>>
    %c2 = arith.constant 2 : index
    %2 = memref.load %arg1[%c2] : memref<8xf32, #tpu.memory_space<smem>>
    %c3 = arith.constant 3 : index
    %3 = memref.load %arg1[%c3] : memref<8xf32, #tpu.memory_space<smem>>
    %c4 = arith.constant 4 : index
    %4 = memref.load %arg1[%c4] : memref<8xf32, #tpu.memory_space<smem>>
    %c5 = arith.constant 5 : index
    %5 = memref.load %arg1[%c5] : memref<8xf32, #tpu.memory_space<smem>>
    %c0_0 = arith.constant 0 : index
    %c0_1 = arith.constant 0 : index
    %c0_2 = arith.constant 0 : index
    %6 = vector.load %arg3[%c0_0, %c0_1, %c0_2] : memref<4x8x128xf32, #tpu.memory_space<vmem>>, vector<1x8x128xf32>
    %7 = vector.shape_cast %6 : vector<1x8x128xf32> to vector<8x128xf32>
    %c1_3 = arith.constant 1 : index
    %c0_4 = arith.constant 0 : index
    %c0_5 = arith.constant 0 : index
    %8 = vector.load %arg3[%c1_3, %c0_4, %c0_5] : memref<4x8x128xf32, #tpu.memory_space<vmem>>, vector<1x8x128xf32>
    %9 = vector.shape_cast %8 : vector<1x8x128xf32> to vector<8x128xf32>
    %c2_6 = arith.constant 2 : index
    %c0_7 = arith.constant 0 : index
    %c0_8 = arith.constant 0 : index
    %10 = vector.load %arg3[%c2_6, %c0_7, %c0_8] : memref<4x8x128xf32, #tpu.memory_space<vmem>>, vector<1x8x128xf32>
    %11 = vector.shape_cast %10 : vector<1x8x128xf32> to vector<8x128xf32>
    %c3_9 = arith.constant 3 : index
    %c0_10 = arith.constant 0 : index
    %c0_11 = arith.constant 0 : index
    %12 = vector.load %arg3[%c3_9, %c0_10, %c0_11] : memref<4x8x128xf32, #tpu.memory_space<vmem>>, vector<1x8x128xf32>
    %13 = vector.shape_cast %12 : vector<1x8x128xf32> to vector<8x128xf32>
    %c0_12 = arith.constant 0 : index
    %c0_13 = arith.constant 0 : index
    %14 = vector.load %arg4[%c0_12, %c0_13] : memref<8x128xf32, #tpu.memory_space<vmem>>, vector<8x128xf32>
    %cst = arith.constant -3.000000e+00 : f32
    %cst_14 = arith.constant 3.000000e+00 : f32
    %15 = vector.broadcast %cst : f32 to vector<8x128xf32>
    %16 = arith.maximumf %15, %14 : vector<8x128xf32>
    %17 = vector.broadcast %cst_14 : f32 to vector<8x128xf32>
    %18 = arith.minimumf %17, %16 : vector<8x128xf32>
    %19 = math.cos %11 : vector<8x128xf32>
    %20 = math.sin %11 : vector<8x128xf32>
    %21 = vector.broadcast %2 : f32 to vector<8x128xf32>
    %22 = arith.mulf %21, %13 : vector<8x128xf32>
    %23 = arith.mulf %22, %13 : vector<8x128xf32>
    %24 = arith.mulf %23, %20 : vector<8x128xf32>
    %25 = arith.addf %18, %24 : vector<8x128xf32>
    %26 = vector.broadcast %1 : f32 to vector<8x128xf32>
    %27 = arith.mulf %25, %26 : vector<8x128xf32>
    %28 = vector.broadcast %5 : f32 to vector<8x128xf32>
    %29 = arith.mulf %28, %19 : vector<8x128xf32>
    %30 = arith.mulf %29, %19 : vector<8x128xf32>
    %31 = vector.broadcast %4 : f32 to vector<8x128xf32>
    %32 = arith.subf %31, %30 : vector<8x128xf32>
    %33 = vector.broadcast %0 : f32 to vector<8x128xf32>
    %34 = arith.mulf %33, %20 : vector<8x128xf32>
    %35 = arith.mulf %19, %27 : vector<8x128xf32>
    %36 = arith.subf %34, %35 : vector<8x128xf32>
    %37 = arith.divf %36, %32 : vector<8x128xf32>
    %38 = vector.broadcast %3 : f32 to vector<8x128xf32>
    %39 = arith.mulf %38, %37 : vector<8x128xf32>
    %40 = arith.mulf %39, %19 : vector<8x128xf32>
    %41 = arith.subf %27, %40 : vector<8x128xf32>
    %cst_15 = arith.constant 5.000000e-02 : f32
    %42 = vector.broadcast %cst_15 : f32 to vector<8x128xf32>
    %43 = arith.mulf %42, %9 : vector<8x128xf32>
    %44 = arith.addf %7, %43 : vector<8x128xf32>
    %c0_16 = arith.constant 0 : index
    %c0_17 = arith.constant 0 : index
    %c0_18 = arith.constant 0 : index
    %45 = vector.load %arg5[%c0_16, %c0_17, %c0_18] : memref<4x8x128xf32, #tpu.memory_space<vmem>>, vector<1x8x128xf32>
    %46 = vector.shape_cast %45 : vector<1x8x128xf32> to vector<8x128xf32>
    %47 = vector.shape_cast %44 : vector<8x128xf32> to vector<1x8x128xf32>
    tpu.vector_store %arg5[%c0_16, %c0_17, %c0_18], %47 {strides = array<i32>} : memref<4x8x128xf32, #tpu.memory_space<vmem>>, vector<1x8x128xf32>,
    %cst_19 = arith.constant 5.000000e-02 : f32
    %48 = vector.broadcast %cst_19 : f32 to vector<8x128xf32>
    %49 = arith.mulf %48, %41 : vector<8x128xf32>
    %50 = arith.addf %9, %49 : vector<8x128xf32>
    %c1_20 = arith.constant 1 : index
    %c0_21 = arith.constant 0 : index
    %c0_22 = arith.constant 0 : index
    %51 = vector.load %arg5[%c1_20, %c0_21, %c0_22] : memref<4x8x128xf32, #tpu.memory_space<vmem>>, vector<1x8x128xf32>
    %52 = vector.shape_cast %51 : vector<1x8x128xf32> to vector<8x128xf32>
    %53 = vector.shape_cast %50 : vector<8x128xf32> to vector<1x8x128xf32>
    tpu.vector_store %arg5[%c1_20, %c0_21, %c0_22], %53 {strides = array<i32>} : memref<4x8x128xf32, #tpu.memory_space<vmem>>, vector<1x8x128xf32>,
    %cst_23 = arith.constant 5.000000e-02 : f32
    %54 = vector.broadcast %cst_23 : f32 to vector<8x128xf32>
    %55 = arith.mulf %54, %13 : vector<8x128xf32>
    %56 = arith.addf %11, %55 : vector<8x128xf32>
    %c2_24 = arith.constant 2 : index
    %c0_25 = arith.constant 0 : index
    %c0_26 = arith.constant 0 : index
    %57 = vector.load %arg5[%c2_24, %c0_25, %c0_26] : memref<4x8x128xf32, #tpu.memory_space<vmem>>, vector<1x8x128xf32>
    %58 = vector.shape_cast %57 : vector<1x8x128xf32> to vector<8x128xf32>
    %59 = vector.shape_cast %56 : vector<8x128xf32> to vector<1x8x128xf32>
    tpu.vector_store %arg5[%c2_24, %c0_25, %c0_26], %59 {strides = array<i32>} : memref<4x8x128xf32, #tpu.memory_space<vmem>>, vector<1x8x128xf32>,
    %cst_27 = arith.constant 5.000000e-02 : f32
    %60 = vector.broadcast %cst_27 : f32 to vector<8x128xf32>
    %61 = arith.mulf %60, %37 : vector<8x128xf32>
    %62 = arith.addf %13, %61 : vector<8x128xf32>
    %c3_28 = arith.constant 3 : index
    %c0_29 = arith.constant 0 : index
    %c0_30 = arith.constant 0 : index
    %63 = vector.load %arg5[%c3_28, %c0_29, %c0_30] : memref<4x8x128xf32, #tpu.memory_space<vmem>>, vector<1x8x128xf32>
    %64 = vector.shape_cast %63 : vector<1x8x128xf32> to vector<8x128xf32>
    %65 = vector.shape_cast %62 : vector<8x128xf32> to vector<1x8x128xf32>
    tpu.vector_store %arg5[%c3_28, %c0_29, %c0_30], %65 {strides = array<i32>} : memref<4x8x128xf32, #tpu.memory_space<vmem>>, vector<1x8x128xf32>,
    return
  }
  func.func @transform_0(%arg0: i32) -> i32 {
    %c0_i32 = arith.constant 0 : i32
    %c0_i32_0 = arith.constant 0 : i32
    return %c0_i32 : i32
  }
  func.func @transform_1(%arg0: i32) -> i32 {
    %c0_i32 = arith.constant 0 : i32
    %c0_i32_0 = arith.constant 0 : i32
    return %c0_i32 : i32
  }
  func.func @transform_2(%arg0: i32) -> (i32, i32, i32) {
    %c0_i32 = arith.constant 0 : i32
    %c0_i32_0 = arith.constant 0 : i32
    %c0_i32_1 = arith.constant 0 : i32
    return %c0_i32, %arg0, %c0_i32_0 : i32, i32, i32
  }
  func.func @transform_3(%arg0: i32) -> (i32, i32) {
    %c0_i32 = arith.constant 0 : i32
    %c0_i32_0 = arith.constant 0 : i32
    return %arg0, %c0_i32 : i32, i32
  }
  func.func @transform_4(%arg0: i32) -> (i32, i32, i32) {
    %c0_i32 = arith.constant 0 : i32
    %c0_i32_0 = arith.constant 0 : i32
    %c0_i32_1 = arith.constant 0 : i32
    return %c0_i32, %arg0, %c0_i32_0 : i32, i32, i32
  }
}

</mosaic_0001>

<bundles_post_ra>
// kernel: cartpole_dx_forward.1
= control target key start
LH: loop header
LB: loop body
LE: loop exit
PB: predicated region body
PF: predicated region fallthrough
CT: control target
= control target key end

     0   :  { %10 = vsyncpa [#allocation4], 0  ;;  %s444_s0 = inlined_call_operand.vmem [shape: f32[8], index: 0, kind: input, shape index: {}]   ;;  %s445_s1 = inlined_call_operand.<no memory space> [shape: s32[1], index: 1, kind: input, shape index: {}]   ;;  %s446_s2 = inlined_call_operand.vmem [shape: f32[4,8,128], index: 2, kind: input, shape index: {}]   ;;  %s447_s3 = inlined_call_operand.vmem [shape: f32[8,128], index: 3, kind: input, shape index: {}]   ;;  %s448_s4 = inlined_call_operand.vmem [shape: f32[4,8,128], index: 4, kind: output, shape index: {}]  }
   0x1   :  { %s17_s17 = sshll.u32 %s444_s0, 4  ;;  %s18_s17 = int_to_ptr.vmem [resolvable:$true] %s17_s17 }
   0x2   :  { %s333_s18 = scalar_lea.vmem %s18_s17, 16  ;;  %p338_p1 = scmp.lt.s32.totalorder %s18_s17, %s18_s17 }
   0x3   :  { %p334_p0 = scmp.ne.s32.totalorder %s18_s17, %s333_s18  ;;  %p339_p2 = scmp.lt.s32.totalorder %s333_s18, %s333_s18 }
   0x5   :  { %p340_p3 = por %p339_p2, %p338_p1 }
   0x7   :  { %p341_p4 = pnand %p340_p3, %p334_p0 }
   0x9   :  { %344 = shalt.err (!%p341_p4)
}
   0xa   :  { %s347_s1 = smov [#allocation3]  }
   0xb   :  { %20 = dma.vmem_to_smem %s18_s17, 16, %s347_s1, [#allocation4]  }
   0xc   :  { %345 = dma.done.wait [#allocation4], 16  }
   0xd   :  { %346 = vsyncadd [#allocation4], 4294967280 }
   0xe   :  { %30 = sfence }
   0xf   :  { %v37_v0 = vld [vmem:[%s446_s2] sm:$0xff]  ;;  %v388_v1 = vld [vmem:[%s446_s2 + $0x8] sm:$0xff]  ;;  %v393_v2 = vld [vmem:[%s446_s2 + $0x10] sm:$0xff]  ;;  %v348_v19 = vmov 683565275   ;;  %s427_s30 = sld [smem:[#allocation3 + $0x5]] }
  0x10   :  { %v276_v3 = vmul.f32 0.05, %v388_v1  ;;  %v50_v5 = vand.u32 2139095040, %v393_v2  ;;  %v47_v7 = vand.u32 2147483647, %v393_v2  ;;  %v404_v8 = vld [vmem:[%s446_s2 + $0x18] sm:$0xff]  ;;  %vm139_vm15 = vweird.f32 %v393_v2 }
  0x11   :  { %v283_v10 = vmul.f32 0.05, %v404_v8  ;;  %v349_v21 = vmov 2475754826   ;;  %v350_v23 = vmov 2131351028  }
  0x12   :  { %v277_v4 = vadd.f32 %v276_v3, %v37_v0  ;;  %v51_v6 = vshrl.u32 %v50_v5, 23  ;;  %v54_v12 = vand.u32 8388607, %v47_v7  ;;  %v351_v25 = vmov 2102212464   ;;  %s297_s2 = sld [smem:[#allocation3 + $0x2]] }
  0x13   :  { %v284_v13 = vadd.f32 %v393_v2, %v283_v10  ;;  %v352_v27 = vmov 920167782   ;;  %v353_v34 = vmov 1326507024   ;;  %vm49_vm7 = vcmp.lt.s32.totalorder %v393_v2, 0  ;;  %s299_s5 = sld [smem:[#allocation3 + $0x4]] }
  0x14   :  { %278 = vst [vmem:[%s448_s4] sm:$0xff] %v277_v4  ;;  %v305_v9 = vadd.s32 4294967169, %v51_v6  ;;  %v55_v16 = vor.u32 8388608, %v54_v12  ;;  %vm48_vm8 = vcmp.le.f32.partialorder %v47_v7, 0.7853982  ;;  %s296_s6 = sld [smem:[#allocation3 + $0x1]] }
  0x15   :  { %314 = vst [vmem:[%s448_s4 + $0x10] sm:$0xff] %v284_v13  ;;  %s31_s9 = sld [smem:[#allocation3]] }
  0x16   :  { %v57_v11 = vadd.s32 1, %v305_v9  ;;  %v95_v36 = vshll.u32 %v55_v16, 8 }
  0x18   :  { %vm58_vm0 = vcmp.gt.s32.totalorder %v57_v11, 0 }
  0x19   :  { %v59_v14 = vsel %vm58_vm0, %v57_v11, 0 }
  0x1a   :  { %v61_v15 = vand.u32 31, %v59_v14  ;;  %v60_v17 = vshrl.u32 %v59_v14, 5 }
  0x1c   :  { %v62_v18 = vsub.s32 32, %v61_v15  ;;  %v64_v20 = vshll.u32 %v348_v19, %v61_v15  ;;  %v67_v22 = vshll.u32 %v349_v21, %v61_v15  ;;  %v70_v24 = vshll.u32 %v350_v23, %v61_v15 }
  0x1d   :  { %v73_v26 = vshll.u32 %v351_v25, %v61_v15  ;;  %v76_v28 = vshll.u32 %v352_v27, %v61_v15  ;;  %vm79_vm1 = vcmp.lt.s32.totalorder %v60_v17, 1  ;;  %vm82_vm2 = vcmp.lt.s32.totalorder %v60_v17, 4 }
  0x1e   :  { %v63_v29 = vshrl.u32 %v348_v19, %v62_v18  ;;  %v65_v30 = vshrl.u32 %v349_v21, %v62_v18  ;;  %v68_v31 = vshrl.u32 %v350_v23, %v62_v18  ;;  %v71_v32 = vshrl.u32 %v351_v25, %v62_v18 }
  0x1f   :  { %v74_v33 = vshrl.u32 %v352_v27, %v62_v18  ;;  %v77_v35 = vshrl.u32 %v353_v34, %v62_v18  ;;  %vm80_vm3 = vcmp.lt.s32.totalorder %v60_v17, 2  ;;  %vm81_vm4 = vcmp.lt.s32.totalorder %v60_v17, 3 }
  0x20   :  { %v66_v37 = vor.u32 %v65_v30, %v64_v20  ;;  %v69_v38 = vor.u32 %v68_v31, %v67_v22  ;;  %v72_v39 = vor.u32 %v71_v32, %v70_v24  ;;  %v254_v32 = vstv %s297_s2 }
  0x21   :  { %v75_v40 = vor.u32 %v74_v33, %v73_v26  ;;  %v78_v41 = vor.u32 %v77_v35, %v76_v28  ;;  %v255_v33 = vmul.f32 %v404_v8, %v254_v32 }
  0x22   :  { %v83_v42 = vsel %vm79_vm1, %v63_v29, %v66_v37  ;;  %v84_v43 = vsel %vm82_vm2, %v72_v39, 2102212464  ;;  %v87_v44 = vsel %vm79_vm1, %v66_v37, %v69_v38  ;;  %v91_v45 = vsel %vm79_vm1, %v69_v38, %v72_v39 }
  0x23   :  { %v85_v46 = vsel %vm81_vm4, %v69_v38, %v84_v43  ;;  %v88_v47 = vsel %vm82_vm2, %v75_v40, 920167782  ;;  %v92_v48 = vsel %vm82_vm2, %v78_v41, 1326507024  ;;  %v261_v43 = vstv %s427_s30 }
  0x24   :  { %v89_v49 = vsel %vm81_vm4, %v72_v39, %v88_v47  ;;  %v93_v50 = vsel %vm81_vm4, %v75_v40, %v92_v48  ;;  %v86_v51 = vsel %vm80_vm3, %v83_v42, %v85_v46  ;;  %v256_v39 = vmul.f32 %v404_v8, %v255_v33  ;;  %v44_v40 = vld [vmem:[%s447_s3] sm:$0xff]  ;;  %s298_s3 = sld [smem:[#allocation3 + $0x3]] }
  0x25   :  { %v90_v52 = vsel %vm80_vm3, %v87_v44, %v89_v49  ;;  %v94_v53 = vsel %vm80_vm3, %v91_v45, %v93_v50  ;;  %v102_v58 = vmul.u32 %v95_v36, %v86_v51  ;;  %v304_v48 = vclamps-f32 %v44_v40, 3.0 }
  0x26   :  { %v413_v54 = vmul.u32.u64.low %v95_v36, %v94_v53  ;;  %v414_v55 = vmul.u32.u64.high %v95_v36, %v94_v53, %v413_v54  ;;  %v416_v56 = vmul.u32.u64.low %v95_v36, %v90_v52  ;;  %v417_v57 = vmul.u32.u64.high %v95_v36, %v90_v52, %v416_v56 }
  0x27   :  { %v259_v54 = vstv %s296_s6 }
  0x28   :  { %vm104_vm5 = vc.u32 %v414_v55, %v416_v56  ;;  %v105_v59 = vadd.s32 1, %v417_v57  ;;  %v103_v10 = vadd.s32 %v416_v56, %v414_v55  ;;  %v266_v56 = vstv %s31_s9 }
  0x2a   :  { %v106_v60 = vsel %vm104_vm5, %v105_v59, %v417_v57 }
  0x2b   :  { %v107_v61 = vadd.s32 %v106_v60, %v102_v58 }
  0x2d   :  { %v108_v62 = vadd.s32 536870912, %v107_v61 }
  0x2f   :  { %v109_v63 = vshrl.u32 %v108_v62, 30 }
  0x31   :  { %v110_v0 = vshll.u32 %v109_v63, 30  ;;  %v133_v24 = vsub.s32 4, %v109_v63 }
  0x33   :  { %v111_v3 = vsub.s32 %v107_v61, %v110_v0  ;;  %v134_v27 = vsel %vm49_vm7, %v133_v24, %v109_v63  ;;  %v272_v61 = vstv %s298_s3 }
  0x34   :  { %v136_v28 = vsel %vm48_vm8, 0, %v134_v27 }
  0x35   :  { %v113_v4 = vsub.s32 0, %v111_v3  ;;  %v243_v29 = vadd.s32 3, %v136_v28  ;;  %v140_v30 = vand.u32 3, %v136_v28 }
  0x37   :  { %v306_v5 = vmin.u32 %v113_v4, %v111_v3  ;;  %v244_v31 = vand.u32 3, %v243_v29  ;;  %vm145_vm9 = vcmp.eq.s32.totalorder %v140_v30, 2  ;;  %vm142_vm11 = vcmp.eq.s32.totalorder %v140_v30, 0 }
  0x38   :  { %vm141_vm13 = vcmp.lt.s32.totalorder %v140_v30, 2 }
  0x39   :  { %v115_v6 = vclz %v306_v5  ;;  %vm249_vm10 = vcmp.eq.s32.totalorder %v244_v31, 2  ;;  %vm246_vm12 = vcmp.eq.s32.totalorder %v244_v31, 0  ;;  %vm245_vm14 = vcmp.lt.s32.totalorder %v244_v31, 2 }
  0x3b   :  { %v307_v9 = vadd.s32 4294967294, %v115_v6 }
  0x3d   :  { %vm308_vm6 = vcmp.lt.s32.totalorder %v307_v9, 0 }
  0x3e   :  { %v118_v11 = vsel %vm308_vm6, 0, %v307_v9 }
  0x3f   :  { %v119_v12 = vsub.s32 32, %v118_v11  ;;  %v120_v13 = vshll.u32 %v111_v3, %v118_v11  ;;  %v123_v14 = vsub.s32 4294967266, %v118_v11 }
  0x41   :  { %v121_v15 = vshrl.u32 %v103_v10, %v119_v12  ;;  %v124_v16 = vadd.s32 127, %v123_v14 }
  0x43   :  { %v122_v17 = vor.u32 %v121_v15, %v120_v13  ;;  %v125_v18 = vshll.u32 %v124_v16, 23 }
  0x45   :  { %v126_v19 = vor.u32 4788187, %v125_v18  ;;  %v129_v20 = vcvt.s32.f32 %v122_v17 }
  0x47   :  { %v127_v21 = vand.u32 2147483647, %v126_v19 }
  0x49   :  { %v130_v22 = vmul.f32 %v129_v20, %v127_v21 }
  0x4b   :  { %v131_v23 = vxor.u32 2147483648, %v130_v22 }
  0x4d   :  { %v132_v25 = vsel %vm49_vm7, %v131_v23, %v130_v22 }
  0x4e   :  { %v135_v26 = vsel %vm48_vm8, %v393_v2, %v132_v25  ;;  %v264_v2 = vstv %s299_s5 }
  0x4f   :  { %327 = vcosq.f32 %v135_v26 }
  0x50   :  { %329 = vsinq.f32 %v135_v26 }
  0x5c   :  { %v328_v34 = vpop.eup %327 }
  0x5d   :  { %v330_v7 = vpop.eup %329  ;;  %v146_v35 = vxor.u32 2147483648, %v328_v34 }
  0x5e   :  { %v143_v36 = vxor.u32 2147483648, %v330_v7 }
  0x5f   :  { %v147_v37 = vsel %vm145_vm9, %v146_v35, %v330_v7  ;;  %v251_v38 = vsel %vm249_vm10, %v146_v35, %v330_v7 }
  0x60   :  { %v144_v41 = vsel %vm142_vm11, %v328_v34, %v143_v36  ;;  %v248_v42 = vsel %vm246_vm12, %v328_v34, %v143_v36 }
  0x61   :  { %v148_v44 = vsel %vm141_vm13, %v144_v41, %v147_v37  ;;  %v252_v45 = vsel %vm245_vm14, %v248_v42, %v251_v38 }
  0x62   :  { %v149_v46 = vsel %vm139_vm15, nan, %v148_v44  ;;  %v253_v47 = vsel %vm139_vm15, nan, %v252_v45 }
  0x63   :  { %v257_v49 = vmul.f32 %v256_v39, %v253_v47  ;;  %v262_v50 = vmul.f32 %v261_v43, %v149_v46  ;;  %v267_v57 = vmul.f32 %v266_v56, %v253_v47 }
  0x65   :  { %v263_v51 = vmul.f32 %v262_v50, %v149_v46  ;;  %v258_v52 = vadd.f32 %v304_v48, %v257_v49 }
  0x67   :  { %v265_v53 = vsub.f32 %v264_v2, %v263_v51  ;;  %v260_v55 = vmul.f32 %v259_v54, %v258_v52 }
  0x69   :  { %331 = vrcp.f32 %v265_v53  ;;  %v268_v58 = vmul.f32 %v260_v55, %v149_v46 }
  0x6b   :  { %v269_v59 = vsub.f32 %v267_v57, %v268_v58 }
  0x76   :  { %v332_v60 = vpop.eup %331 }
  0x77   :  { %v271_v62 = vmul.f32 %v332_v60, %v269_v59 }
  0x79   :  { %v273_v63 = vmul.f32 %v272_v61, %v271_v62  ;;  %v287_v0 = vmul.f32 0.05, %v271_v62 }
  0x7b   :  { %v274_v3 = vmul.f32 %v273_v63, %v149_v46  ;;  %v288_v4 = vadd.f32 %v404_v8, %v287_v0 }
  0x7d   :  { %v275_v5 = vsub.f32 %v260_v55, %v274_v3  ;;  %315 = vst [vmem:[%s448_s4 + $0x18] sm:$0xff] %v288_v4 }
  0x7f   :  { %v279_v6 = vmul.f32 0.05, %v275_v5 }
  0x81   :  { %v280_v9 = vadd.f32 %v388_v1, %v279_v6 }
  0x83   :  { %313 = vst [vmem:[%s448_s4 + $0x8] sm:$0xff] %v280_v9 }
  0x84   :  { %295 = vsyncpa [#allocation4], 1 }

</bundles_post_ra>
